<compile_context>
chip_gen: v6e
topology: v6e:2x2x1
jax: 0.10.0
libtpu: 0.0.40
codegen_flags: <defaults>
</compile_context>

<pallas_src>
import functools

import jax
import jax.numpy as jnp
from jax.experimental import pallas as pl
from jax.experimental.pallas import tpu as pltpu


def _round_up(x, m):
    return (x + m - 1) // m * m


def _pad2d(a, rows, cols):
    r, c = a.shape
    if r == rows and c == cols:
        return a
    return jnp.pad(a, ((0, rows - r), (0, cols - c)))


@functools.lru_cache(maxsize=1)
def _vmem_capacity_bytes():
    """Physical VMEM per TensorCore; conservative fallback is v7x (64 MiB)."""
    try:
        return int(pltpu.get_tpu_info().vmem_capacity_bytes)
    except Exception:
        return 64 << 20


def _choose_tk(d_in_p128, tk_cap):
    """Largest multiple of 128 that divides d_in_p128 and is <= tk_cap.

    Choosing a divisor means d_in is never padded beyond lane (128) alignment,
    so no zero K-blocks are streamed from HBM or pushed through the MXU.
    """
    n = d_in_p128 // 128
    best = 128
    for m in range(1, n + 1):
        if n % m == 0 and m * 128 <= tk_cap:
            best = m * 128
    return best


def _vmem_footprint(tm, tk, emb_p, proj_p, in_itemsize, out_itemsize):
    """Estimated VMEM use, counting Pallas' default double-buffering of every
    BlockSpec operand (including the grid-invariant head weights) and of the
    outputs, plus the f32 accumulator and headroom for Mosaic scratch."""
    streamed = 2 * (tm * tk + tk * emb_p) * in_itemsize            # x, w_enc
    resident = 2 * (emb_p * emb_p + emb_p * proj_p) * in_itemsize  # w1, w2 (2x!)
    biases = 2 * (2 * emb_p + proj_p) * 4                          # b_enc, b1, b2
    acc = tm * emb_p * 4                                           # f32 accumulator
    outs = 2 * (tm * emb_p + tm * proj_p) * out_itemsize           # h, z (bf16)
    return streamed + resident + biases + acc + outs + (2 << 20)


def _select_tiling(B, d_in, emb_p, proj_p, tm_req, tk_req,
                   in_itemsize, out_itemsize):
    """Pick (tm, tk, b_p, d_in_p, vmem_limit) for the current TPU generation."""
    vmem_cap = _vmem_capacity_bytes()
    big_vmem = vmem_cap >= (96 << 20)        # v5e / v6e: 128 MiB; v7x: 64 MiB
    # Target footprint: ~100 MiB on 128 MiB parts, <=48 MiB on v7x's 64 MiB.
    budget = min(vmem_cap - (16 << 20), (100 << 20) if big_vmem else (48 << 20))

    d_in_128 = _round_up(d_in, 128)
    tk_cap = tk_req if tk_req is not None else (4096 if big_vmem else 1024)
    tk = _choose_tk(d_in_128, _round_up(min(tk_cap, d_in_128), 128))

    b_p8 = _round_up(B, 8)
    tm_target = tm_req if tm_req is not None else (1024 if big_vmem else 512)
    tm = min(_round_up(tm_target, 8), b_p8)
    # v7x heuristic (64 MiB part => 2 TensorCores/chip): keep at least 2 batch
    # tiles so the "parallel" grid axis shards across both cores; each core
    # then streams w_enc once, which v7x's 3.2 TB/s HBM absorbs.
    if (not big_vmem) and tm_req is None and b_p8 >= 16 and b_p8 <= tm:
        tm = _round_up((b_p8 + 1) // 2, 8)

    # Shrink until the double-buffered footprint fits the budget
    # (prefer keeping tm -- it sets w_enc reuse -- and shrink tk first).
    while _vmem_footprint(tm, tk, emb_p, proj_p,
                          in_itemsize, out_itemsize) > budget:
        if tk > 512:
            tk = _choose_tk(d_in_128, tk // 2)
        elif tm > 8:
            tm = max(8, _round_up(tm // 2, 8))
        else:
            break

    b_p = _round_up(b_p8, tm)
    d_in_p = _round_up(d_in, tk)   # tk divides d_in_128, so d_in_p == d_in_128
    footprint = _vmem_footprint(tm, tk, emb_p, proj_p, in_itemsize, out_itemsize)
    # Never request more than physical VMEM (minus headroom), never less than
    # the actual footprint estimate (avoids compiler-forced spills).
    vmem_limit = int(min(max(footprint, 16 << 20), vmem_cap - (4 << 20)))
    return tm, tk, b_p, d_in_p, vmem_limit


def simclr_kernel(x_ref, w_enc_ref, b_enc_ref,
                  w1_ref, b1_ref, w2_ref, b2_ref,
                  h_ref, z_ref, acc_ref):
    k = pl.program_id(1)

    @pl.when(k == 0)
    def _():
        acc_ref[...] = jnp.zeros_like(acc_ref)

    # Encoder GEMM partial product (bf16 operands, f32 accumulation on MXU).
    acc_ref[...] += jnp.dot(x_ref[...], w_enc_ref[...],
                            preferred_element_type=jnp.float32)

    @pl.when(k == pl.num_programs(1) - 1)
    def _():
        # Bias + ReLU applied once, in f32; h written back in bf16.
        h_f32 = jnp.maximum(acc_ref[...] + b_enc_ref[...], 0.0)
        h_lo = h_f32.astype(h_ref.dtype)
        h_ref[...] = h_lo

        # Projection head: Linear -> ReLU -> Linear (weights VMEM-resident),
        # computed from the same bf16 h that is written back.
        a = jnp.dot(h_lo, w1_ref[...],
                    preferred_element_type=jnp.float32) + b1_ref[...]
        a = jnp.maximum(a, 0.0)
        z = jnp.dot(a.astype(w2_ref.dtype), w2_ref[...],
                    preferred_element_type=jnp.float32) + b2_ref[...]
        z_ref[...] = z.astype(z_ref.dtype)


@functools.partial(jax.jit, static_argnames=("tm", "tk", "compute_dtype"))
def simclr_forward(x_nchw, params, *, tm=None, tk=None,
                   compute_dtype=jnp.bfloat16):
    """x_nchw: (B, C, H, W) float32. Returns (h, z) in float32.

    tm / tk = None means: auto-select per TPU generation (VMEM capacity)."""
    w_enc, b_enc, w1, b1, w2, b2 = params
    B = x_nchw.shape[0]
    d_in = x_nchw.shape[1] * x_nchw.shape[2] * x_nchw.shape[3]
    emb = w_enc.shape[1]
    proj = w2.shape[1]

    cd = compute_dtype
    out_dtype = cd                               # bf16 h/z writeback
    in_it = jnp.dtype(cd).itemsize
    out_it = jnp.dtype(out_dtype).itemsize

    # ---- padded / tiled problem sizes (generation-aware) ------------------
    emb_p = _round_up(emb, 128)                  # lane-dense h / head inputs
    proj_p = _round_up(proj, 128)                # lane-dense z
    tm, tk, b_p, d_in_p, vmem_limit = _select_tiling(
        B, d_in, emb_p, proj_p, tm, tk, in_it, out_it)

    # Metadata-only flatten (NCHW contiguous == torch .view(B, -1)).
    x_flat = x_nchw.reshape(B, d_in)
    x_p = _pad2d(x_flat, b_p, d_in_p).astype(cd)
    w_enc_p = _pad2d(w_enc, d_in_p, emb_p).astype(cd)
    w1_p = _pad2d(w1, emb_p, emb_p).astype(cd)
    w2_p = _pad2d(w2, emb_p, proj_p).astype(cd)
    b_enc_p = _pad2d(b_enc.reshape(1, emb), 1, emb_p).astype(jnp.float32)
    b1_p = _pad2d(b1.reshape(1, emb), 1, emb_p).astype(jnp.float32)
    b2_p = _pad2d(b2.reshape(1, proj), 1, proj_p).astype(jnp.float32)

    grid = (b_p // tm, d_in_p // tk)
    num_i = grid[0]

    flops = 2 * b_p * (d_in_p * emb_p + emb_p * emb_p + emb_p * proj_p)
    # Truthful HBM footprint: x once, w_enc re-streamed per batch tile,
    # resident head weights once, bf16 output writebacks.
    bytes_accessed = int(
        b_p * d_in_p * in_it
        + num_i * d_in_p * emb_p * in_it
        + (emb_p * emb_p + emb_p * proj_p) * in_it
        + (2 * emb_p + proj_p) * 4
        + (b_p * emb_p + b_p * proj_p) * out_it)

    h_full, z_full = pl.pallas_call(
        simclr_kernel,
        out_shape=(
            jax.ShapeDtypeStruct((b_p, emb_p), out_dtype),
            jax.ShapeDtypeStruct((b_p, proj_p), out_dtype),
        ),
        grid_spec=pltpu.PrefetchScalarGridSpec(
            num_scalar_prefetch=0,
            grid=grid,
            in_specs=[
                pl.BlockSpec((tm, tk), lambda i, k: (i, k)),         # x tile
                pl.BlockSpec((tk, emb_p), lambda i, k: (k, 0)),      # w_enc
                pl.BlockSpec((1, emb_p), lambda i, k: (0, 0)),       # b_enc
                pl.BlockSpec((emb_p, emb_p), lambda i, k: (0, 0)),   # w1
                pl.BlockSpec((1, emb_p), lambda i, k: (0, 0)),       # b1
                pl.BlockSpec((emb_p, proj_p), lambda i, k: (0, 0)),  # w2
                pl.BlockSpec((1, proj_p), lambda i, k: (0, 0)),      # b2
            ],
            out_specs=(
                pl.BlockSpec((tm, emb_p), lambda i, k: (i, 0)),      # h
                pl.BlockSpec((tm, proj_p), lambda i, k: (i, 0)),     # z
            ),
            scratch_shapes=[pltpu.VMEM((tm, emb_p), jnp.float32)],
        ),
        compiler_params=pltpu.CompilerParams(
            dimension_semantics=("parallel", "arbitrary"),
            vmem_limit_bytes=vmem_limit,
        ),
        cost_estimate=pl.CostEstimate(
            flops=flops, transcendentals=0, bytes_accessed=bytes_accessed),
    )(x_p, w_enc_p, b_enc_p, w1_p, b1_p, w2_p, b2_p)

    # Strip TPU padding and return float32 to match the module's output dtype.
    h = h_full[:B, :emb].astype(jnp.float32)
    z = z_full[:B, :proj].astype(jnp.float32)
    return h, z


def make_params(key, d_in, embedding_dim, projection_size):
    ks = jax.random.split(key, 6)
    scale = lambda fan_in: 1.0 / jnp.sqrt(jnp.float32(fan_in))
    w_enc = jax.random.normal(ks[0], (d_in, embedding_dim), jnp.float32) * scale(d_in)
    b_enc = jax.random.normal(ks[1], (1, embedding_dim), jnp.float32) * 0.01
    w1 = jax.random.normal(ks[2], (embedding_dim, embedding_dim), jnp.float32) * scale(embedding_dim)
    b1 = jax.random.normal(ks[3], (1, embedding_dim), jnp.float32) * 0.01
    w2 = jax.random.normal(ks[4], (embedding_dim, projection_size), jnp.float32) * scale(embedding_dim)
    b2 = jax.random.normal(ks[5], (1, projection_size), jnp.float32) * 0.01
    return (w_enc, b_enc, w1, b1, w2, b2)


if __name__ == "__main__":
    # Small demo shapes: batch=2, channels=4, spatial=16x16,
    # embedding_dim=32, projection_size=128 (module default).
    B, C, H, W = 2, 4, 16, 16
    embedding_dim = 32
    projection_size = 128
    d_in = C * H * W

    key = jax.random.PRNGKey(0)
    kx, kp = jax.random.split(key)
    x = jax.random.normal(kx, (B, C, H, W), jnp.float32)
    params = make_params(kp, d_in, embedding_dim, projection_size)

    # tk=256 -> 4 reduction steps over d_in=1024, exercising the accumulator;
    # tm auto-selected (collapses to 8 for this tiny batch).
    h, z = simclr_forward(x, params, tk=256)
    jax.block_until_ready((h, z))

    w_enc, b_enc, w1, b1, w2, b2 = params
    xf = x.reshape(B, d_in)

    # Reference with the same bf16-operand / f32-accumulate numerics.
    cd = jnp.bfloat16
    h_ref = jnp.maximum(jnp.dot(xf.astype(cd), w_enc.astype(cd),
                                preferred_element_type=jnp.float32) + b_enc, 0.0)
    a_ref = jnp.maximum(jnp.dot(h_ref.astype(cd), w1.astype(cd),
                                preferred_element_type=jnp.float32) + b1, 0.0)
    z_ref = jnp.dot(a_ref.astype(cd), w2.astype(cd),
                    preferred_element_type=jnp.float32) + b2

    assert h.shape == (B, embedding_dim) and z.shape == (B, projection_size)
    # h / z are written back in bf16, so allow bf16-rounding tolerance.
    assert jnp.allclose(h, h_ref, atol=2e-2, rtol=2e-2)
    assert jnp.allclose(z, z_ref, atol=2e-2, rtol=2e-2)

    # Loose sanity check against the pure-f32 module semantics (bf16 error).
    h_f32 = jnp.maximum(xf @ w_enc + b_enc, 0.0)
    a_f32 = jnp.maximum(h_f32 @ w1 + b1, 0.0)
    z_f32 = a_f32 @ w2 + b2
    assert jnp.allclose(h, h_f32, atol=1e-1, rtol=1e-1)
    assert jnp.allclose(z, z_f32, atol=1e-1, rtol=1e-1)

    print("KERNEL_OK")
</pallas_src>

<mosaic_0001>
module attributes {stable_mosaic.version = 11 : i64} {
  func.func @simclr_kernel(%arg0: i32, %arg1: i32, %arg2: memref<8x256xbf16, #tpu.memory_space<vmem>>, %arg3: memref<256x128xbf16, #tpu.memory_space<vmem>>, %arg4: memref<1x128xf32, #tpu.memory_space<vmem>>, %arg5: memref<128x128xbf16, #tpu.memory_space<vmem>>, %arg6: memref<1x128xf32, #tpu.memory_space<vmem>>, %arg7: memref<128x128xbf16, #tpu.memory_space<vmem>>, %arg8: memref<1x128xf32, #tpu.memory_space<vmem>>, %arg9: memref<8x128xbf16, #tpu.memory_space<vmem>>, %arg10: memref<8x128xbf16, #tpu.memory_space<vmem>>, %arg11: memref<8x128xf32, #tpu.memory_space<vmem>>) attributes {dimension_semantics = [#tpu.dimension_semantics<parallel>, #tpu.dimension_semantics<arbitrary>], iteration_bounds = array<i64: 1, 4>, scalar_prefetch = 0 : i64, scratch_operands = 1 : i64, tpu.core_type = #tpu.core_type<tc>, window_params = [{transform_indices = @transform_0, window_bounds = array<i64: 8, 256>}, {transform_indices = @transform_1, window_bounds = array<i64: 256, 128>}, {pipeline_mode = #tpu.pipeline_mode<synchronous>, transform_indices = @transform_2, window_bounds = array<i64: 1, 128>}, {pipeline_mode = #tpu.pipeline_mode<synchronous>, transform_indices = @transform_3, window_bounds = array<i64: 128, 128>}, {pipeline_mode = #tpu.pipeline_mode<synchronous>, transform_indices = @transform_4, window_bounds = array<i64: 1, 128>}, {pipeline_mode = #tpu.pipeline_mode<synchronous>, transform_indices = @transform_5, window_bounds = array<i64: 128, 128>}, {pipeline_mode = #tpu.pipeline_mode<synchronous>, transform_indices = @transform_6, window_bounds = array<i64: 1, 128>}, {transform_indices = @transform_7, window_bounds = array<i64: 8, 128>}, {transform_indices = @transform_8, window_bounds = array<i64: 8, 128>}]} {
    %c0_i32 = arith.constant 0 : i32
    %0 = arith.cmpi eq, %arg1, %c0_i32 : i32
    %1 = arith.extui %0 : i1 to i32
    %c0_i32_0 = arith.constant 0 : i32
    %2 = arith.cmpi ne, %1, %c0_i32_0 : i32
    scf.if %2 {
      %cst_9 = arith.constant 0.000000e+00 : f32
      %12 = vector.broadcast %cst_9 : f32 to vector<8x128xf32>
      %c0_10 = arith.constant 0 : index
      %c0_11 = arith.constant 0 : index
      %13 = vector.load %arg11[%c0_10, %c0_11] : memref<8x128xf32, #tpu.memory_space<vmem>>, vector<8x128xf32>
      tpu.vector_store %arg11[%c0_10, %c0_11], %12 {strides = array<i32>} : memref<8x128xf32, #tpu.memory_space<vmem>>, vector<8x128xf32>,
    } else {
    }
    %c0 = arith.constant 0 : index
    %c0_1 = arith.constant 0 : index
    %3 = vector.load %arg11[%c0, %c0_1] : memref<8x128xf32, #tpu.memory_space<vmem>>, vector<8x128xf32>
    %c0_2 = arith.constant 0 : index
    %c0_3 = arith.constant 0 : index
    %4 = vector.load %arg2[%c0_2, %c0_3] : memref<8x256xbf16, #tpu.memory_space<vmem>>, vector<8x256xbf16>
    %c0_4 = arith.constant 0 : index
    %c0_5 = arith.constant 0 : index
    %5 = vector.load %arg3[%c0_4, %c0_5] : memref<256x128xbf16, #tpu.memory_space<vmem>>, vector<256x128xbf16>
    %cst = arith.constant dense<0.000000e+00> : vector<8x128xf32>
    %6 = tpu.matmul %4, %5, %cst {dimension_numbers = #tpu.dot_dimension_numbers<[1], [0], [0], [1], [0, 0, 1, 1], [], []>} : vector<8x256xbf16>, vector<256x128xbf16>, vector<8x128xf32> -> vector<8x128xf32>
    %7 = arith.addf %3, %6 : vector<8x128xf32>
    %c0_6 = arith.constant 0 : index
    %c0_7 = arith.constant 0 : index
    %8 = vector.load %arg11[%c0_6, %c0_7] : memref<8x128xf32, #tpu.memory_space<vmem>>, vector<8x128xf32>
    tpu.vector_store %arg11[%c0_6, %c0_7], %7 {strides = array<i32>} : memref<8x128xf32, #tpu.memory_space<vmem>>, vector<8x128xf32>,
    %c3_i32 = arith.constant 3 : i32
    %9 = arith.cmpi eq, %arg1, %c3_i32 : i32
    %10 = arith.extui %9 : i1 to i32
    %c0_i32_8 = arith.constant 0 : i32
    %11 = arith.cmpi ne, %10, %c0_i32_8 : i32
    scf.if %11 {
      %c0_9 = arith.constant 0 : index
      %c0_10 = arith.constant 0 : index
      %12 = vector.load %arg11[%c0_9, %c0_10] : memref<8x128xf32, #tpu.memory_space<vmem>>, vector<8x128xf32>
      %c0_11 = arith.constant 0 : index
      %c0_12 = arith.constant 0 : index
      %13 = vector.load %arg4[%c0_11, %c0_12] : memref<1x128xf32, #tpu.memory_space<vmem>>, vector<1x128xf32>
      %14 = vector.broadcast %13 : vector<1x128xf32> to vector<8x128xf32>
      %15 = arith.addf %12, %14 : vector<8x128xf32>
      %cst_13 = arith.constant 0.000000e+00 : f32
      %16 = vector.broadcast %cst_13 : f32 to vector<8x128xf32>
      %17 = arith.maximumf %15, %16 : vector<8x128xf32>
      %18 = arith.truncf %17 : vector<8x128xf32> to vector<8x128xbf16>
      %c0_14 = arith.constant 0 : index
      %c0_15 = arith.constant 0 : index
      %19 = vector.load %arg9[%c0_14, %c0_15] : memref<8x128xbf16, #tpu.memory_space<vmem>>, vector<8x128xbf16>
      tpu.vector_store %arg9[%c0_14, %c0_15], %18 {strides = array<i32>} : memref<8x128xbf16, #tpu.memory_space<vmem>>, vector<8x128xbf16>,
      %c0_16 = arith.constant 0 : index
      %c0_17 = arith.constant 0 : index
      %20 = vector.load %arg5[%c0_16, %c0_17] : memref<128x128xbf16, #tpu.memory_space<vmem>>, vector<128x128xbf16>
      %cst_18 = arith.constant dense<0.000000e+00> : vector<8x128xf32>
      %21 = tpu.matmul %18, %20, %cst_18 {dimension_numbers = #tpu.dot_dimension_numbers<[1], [0], [0], [1], [0, 0, 1, 1], [], []>} : vector<8x128xbf16>, vector<128x128xbf16>, vector<8x128xf32> -> vector<8x128xf32>
      %c0_19 = arith.constant 0 : index
      %c0_20 = arith.constant 0 : index
      %22 = vector.load %arg6[%c0_19, %c0_20] : memref<1x128xf32, #tpu.memory_space<vmem>>, vector<1x128xf32>
      %23 = vector.broadcast %22 : vector<1x128xf32> to vector<8x128xf32>
      %24 = arith.addf %21, %23 : vector<8x128xf32>
      %cst_21 = arith.constant 0.000000e+00 : f32
      %25 = vector.broadcast %cst_21 : f32 to vector<8x128xf32>
      %26 = arith.maximumf %24, %25 : vector<8x128xf32>
      %27 = arith.truncf %26 : vector<8x128xf32> to vector<8x128xbf16>
      %c0_22 = arith.constant 0 : index
      %c0_23 = arith.constant 0 : index
      %28 = vector.load %arg7[%c0_22, %c0_23] : memref<128x128xbf16, #tpu.memory_space<vmem>>, vector<128x128xbf16>
      %cst_24 = arith.constant dense<0.000000e+00> : vector<8x128xf32>
      %29 = tpu.matmul %27, %28, %cst_24 {dimension_numbers = #tpu.dot_dimension_numbers<[1], [0], [0], [1], [0, 0, 1, 1], [], []>} : vector<8x128xbf16>, vector<128x128xbf16>, vector<8x128xf32> -> vector<8x128xf32>
      %c0_25 = arith.constant 0 : index
      %c0_26 = arith.constant 0 : index
      %30 = vector.load %arg8[%c0_25, %c0_26] : memref<1x128xf32, #tpu.memory_space<vmem>>, vector<1x128xf32>
      %31 = vector.broadcast %30 : vector<1x128xf32> to vector<8x128xf32>
      %32 = arith.addf %29, %31 : vector<8x128xf32>
      %33 = arith.truncf %32 : vector<8x128xf32> to vector<8x128xbf16>
      %c0_27 = arith.constant 0 : index
      %c0_28 = arith.constant 0 : index
      %34 = vector.load %arg10[%c0_27, %c0_28] : memref<8x128xbf16, #tpu.memory_space<vmem>>, vector<8x128xbf16>
      tpu.vector_store %arg10[%c0_27, %c0_28], %33 {strides = array<i32>} : memref<8x128xbf16, #tpu.memory_space<vmem>>, vector<8x128xbf16>,
    } else {
    }
    return
  }
  func.func @transform_0(%arg0: i32, %arg1: i32) -> (i32, i32) {
    %c0_i32 = arith.constant 0 : i32
    return %arg0, %arg1 : i32, i32
  }
  func.func @transform_1(%arg0: i32, %arg1: i32) -> (i32, i32) {
    %c0_i32 = arith.constant 0 : i32
    %c0_i32_0 = arith.constant 0 : i32
    return %arg1, %c0_i32 : i32, i32
  }
  func.func @transform_2(%arg0: i32, %arg1: i32) -> (i32, i32) {
    %c0_i32 = arith.constant 0 : i32
    %c0_i32_0 = arith.constant 0 : i32
    %c0_i32_1 = arith.constant 0 : i32
    return %c0_i32, %c0_i32_0 : i32, i32
  }
  func.func @transform_3(%arg0: i32, %arg1: i32) -> (i32, i32) {
    %c0_i32 = arith.constant 0 : i32
    %c0_i32_0 = arith.constant 0 : i32
    %c0_i32_1 = arith.constant 0 : i32
    return %c0_i32, %c0_i32_0 : i32, i32
  }
  func.func @transform_4(%arg0: i32, %arg1: i32) -> (i32, i32) {
    %c0_i32 = arith.constant 0 : i32
    %c0_i32_0 = arith.constant 0 : i32
    %c0_i32_1 = arith.constant 0 : i32
    return %c0_i32, %c0_i32_0 : i32, i32
  }
  func.func @transform_5(%arg0: i32, %arg1: i32) -> (i32, i32) {
    %c0_i32 = arith.constant 0 : i32
    %c0_i32_0 = arith.constant 0 : i32
    %c0_i32_1 = arith.constant 0 : i32
    return %c0_i32, %c0_i32_0 : i32, i32
  }
  func.func @transform_6(%arg0: i32, %arg1: i32) -> (i32, i32) {
    %c0_i32 = arith.constant 0 : i32
    %c0_i32_0 = arith.constant 0 : i32
    %c0_i32_1 = arith.constant 0 : i32
    return %c0_i32, %c0_i32_0 : i32, i32
  }
  func.func @transform_7(%arg0: i32, %arg1: i32) -> (i32, i32) {
    %c0_i32 = arith.constant 0 : i32
    %c0_i32_0 = arith.constant 0 : i32
    return %arg0, %c0_i32 : i32, i32
  }
  func.func @transform_8(%arg0: i32, %arg1: i32) -> (i32, i32) {
    %c0_i32 = arith.constant 0 : i32
    %c0_i32_0 = arith.constant 0 : i32
    return %arg0, %c0_i32 : i32, i32
  }
}

</mosaic_0001>

<bundles_post_ra>
// kernel: simclr_forward.1
= control target key start
LH: loop header
LB: loop body
LE: loop exit
PB: predicated region body
PF: predicated region fallthrough
CT: control target
= control target key end

     0   :  { %s1161_s27 = smov 0   ;;  %s1163_s28 = smov 0   ;;  %s1281_s0 = inlined_call_operand.vmem [shape: bf16[8,1024], index: 0, kind: input, shape index: {}]   ;;  %s1282_s1 = inlined_call_operand.vmem [shape: bf16[1024,128], index: 1, kind: input, shape index: {}]   ;;  %s1283_s2 = inlined_call_operand.vmem [shape: f32[1,128], index: 2, kind: input, shape index: {}]   ;;  %s1284_s3 = inlined_call_operand.vmem [shape: bf16[128,128], index: 3, kind: input, shape index: {}]   ;;  %s1285_s4 = inlined_call_operand.vmem [shape: f32[1,128], index: 4, kind: input, shape index: {}]   ;;  %s1286_s5 = inlined_call_operand.vmem [shape: bf16[128,128], index: 5, kind: input, shape index: {}]   ;;  %s1287_s6 = inlined_call_operand.vmem [shape: f32[1,128], index: 6, kind: input, shape index: {}]   ;;  %s1288_s7 = inlined_call_operand.vmem [shape: bf16[8,128], index: 7, kind: output, shape index: {0}]   ;;  %s1289_s8 = inlined_call_operand.vmem [shape: bf16[8,128], index: 8, kind: output, shape index: {1}]  }
   0x1   :  { %s1165_s29 = smov 0  }
   0x2 LB: > { %s28_s30 = sadd.s32 1, %s1107_s28  ;;  %p900_p0 = scmp.ge.s32.totalorder %s1111_s29, 1  ;;  %s1111_s29 = sphi %s1165_s29, %s19_s29   ;;  %s1107_s28 = sphi %s1163_s28, %s1291_s28   ;;  %s1103_s27 = sphi %s1161_s27, %s1290_s27  }
   0x3   : > { %p29_p1 = scmp.ge.s32.totalorder %s28_s30, 4  ;;  %p295_p2 = scmp.lt.s32.totalorder %s1111_s29, 5 }
   0x5   : > { %s1293_s30 = smov (%p29_p1, %s28_s30), 0  ;;  %p296_p3 = pnand %p900_p0, %p295_p2 }
   0x6   : > { %s901_s9 = sshll.u32 (!%p296_p3), %s1103_s27, 1  ;;  %s903_s10 = sshll.u32 (!%p296_p3), %s1103_s27, 5 }
   0x7   : > { %299 = sbr.rel (%p296_p3) target bundleno = 686 (0x2ae), region = 48  ;;  %p344_p4 = scmp.lt.s32.totalorder (!%p296_p3), %s901_s9, 7 }
   0x8   : > { %p352_p5 = scmp.lt.s32.totalorder (!%p296_p3), %s903_s10, 127  ;;  %p905_p6 = scmp.ne.s32.totalorder (!%p296_p3), %s1103_s27, 0 }
   0xc   : > { %s1295_s9 = smov (!%p344_p4, %s901_s9), 7  ;;  %s1297_s10 = smov (!%p352_p5, %s903_s10), 127 }
   0xd   : > { %s902_s11 = sshll.u32 %s1295_s9, 2  ;;  %s904_s15 = sshll.u32 %s1297_s10, 2 }
   0xe   : > { %s349_s14 = scalar_lea.vmem %s1281_s0, %s902_s11  ;;  %s1189_s18 = scalar_lea.vmem %s1282_s1, %s904_s15 }
   0xf   : > { %369 = sbr.rel (%p905_p6) target bundleno = 22 (0x16), region = 52 }
  0x14   : > { %v1113_v0 = vmov 0.0  }
  0x15   : > { %370 = vst [vmem:[#allocation2] sm:$0xff] %v1113_v0 }
  0x16 PF: > { %v1055_v1 = vld [vmem:[%s1189_s18 + $0x78] sm:$0xff]   ;;  %v1057_v3 = vld [vmem:[%s1189_s18 + $0x70] sm:$0xff]   ;;  %v1059_v5 = vld [vmem:[%s1189_s18 + $0x68] sm:$0xff]   ;;  %p924_p7 = scmp.ne.s32.totalorder %s1103_s27, 3 }
  0x17   : > { %v1056_v2 = vld [vmem:[%s1189_s18 + $0x38] sm:$0xff]   ;;  %948 = vmatprep.subr.bf16.mxu0 %v1055_v1  ;;  %v1058_v4 = vld [vmem:[%s1189_s18 + $0x30] sm:$0xff]   ;;  %v1060_v6 = vld [vmem:[%s1189_s18 + $0x28] sm:$0xff]  }
  0x18   : > { %949 = vmatpush3.bf16.msra.mxu0 %v1056_v2  ;;  %v1061_v7 = vld [vmem:[%s1189_s18 + $0x60] sm:$0xff]   ;;  %v1063_v9 = vld [vmem:[%s1189_s18 + $0x58] sm:$0xff]   ;;  %v1065_v11 = vld [vmem:[%s1189_s18 + $0x50] sm:$0xff]  }
  0x19   : > { %950 = vmatprep.subr.bf16.mxu0 %v1057_v3  ;;  %v1062_v8 = vld [vmem:[%s1189_s18 + $0x20] sm:$0xff]   ;;  %v1064_v10 = vld [vmem:[%s1189_s18 + $0x18] sm:$0xff]   ;;  %v1066_v14 = vld [vmem:[%s1189_s18 + $0x10] sm:$0xff]  }
  0x1a   : > { %v372_v12 = vld [vmem:[%s349_s14] sm:$0xff]  ;;  %v1067_v15 = vld [vmem:[%s1189_s18 + $0x48] sm:$0xff]  }
  0x1b   : > { %v907_v13 = vcombine.high %v372_v12, %v372_v12  ;;  %v1068_v16 = vld [vmem:[%s1189_s18 + $0x8] sm:$0xff]   ;;  %v1069_v17 = vld [vmem:[%s1189_s18 + $0x40] sm:$0xff]   ;;  %v906_v19 = vcombine.low %v372_v12, %v372_v12 }
  0x1c   : > { %951 = vmatpush3.bf16.msra.mxu0 %v1058_v4  ;;  %v1070_v18 = vld [vmem:[%s1189_s18] sm:$0xff]  }
  0x1d   : > { %952 = vmatprep.subr.bf16.mxu0 %v1059_v5  ;;  %540 = vmatprep.mubr.bf16.mxu0 %v907_v13  ;;  %v371_v21 = vld [vmem:[#allocation2] sm:$0xff] }
  0x20   : > { %953 = vmatpush3.bf16.msra.mxu0 %v1060_v6 }
  0x21   : > { %954 = vmatprep.subr.bf16.mxu0 %v1061_v7 }
  0x24   : > { %955 = vmatpush3.bf16.msra.mxu0 %v1062_v8 }
  0x25   : > { %956 = vmatprep.subr.bf16.mxu0 %v1063_v9 }
  0x28   : > { %957 = vmatpush3.bf16.msra.mxu0 %v1064_v10 }
  0x29   : > { %958 = vmatprep.subr.bf16.mxu0 %v1065_v11 }
  0x2c   : > { %959 = vmatpush3.bf16.msra.mxu0 %v1066_v14 }
  0x2d   : > { %960 = vmatprep.subr.bf16.mxu0 %v1067_v15 }
  0x30   : > { %961 = vmatpush3.bf16.msra.mxu0 %v1068_v16 }
  0x31   : > { %962 = vmatprep.subr.bf16.mxu0 %v1069_v17 }
  0x34   : > { %963 = vmatpush3.bf16.msra.mxu0 %v1070_v18 }
  0x37   : > { %541 = vmatmul.mubr.bf16.vlgmr.msra.gmra.mxu0 %v906_v19 }
  0xf7   : > { %v964_v20 = vpop.f32.mrf.mxu0 }
  0xf9   : > { %v965_v22 = vpop.f32.mrf.mxu0 }
  0xfa   : > { %v966_v23 = vadd.f32 %v965_v22, %v964_v20  ;;  %553 = sbr.rel (%p924_p7) target bundleno = 686 (0x2ae), region = 56 }
  0xfb   : > { %v967_v24 = vpop.f32.mrf.mxu0 }
  0xfc   : > { %v548_v25 = vadd.f32 %v966_v23, %v371_v21 }
  0xfd   : > { %v968_v26 = vpop.f32.mrf.mxu0 }
  0xfe   : > { %549 = vst [vmem:[#allocation2] sm:$0xff] %v548_v25 }
  0xff   : > { %v1073_v27 = vld [vmem:[%s1284_s3 + $0x38] sm:$0xff]   ;;  %v1114_v28 = vmov 0.0   ;;  %v1074_v29 = vld [vmem:[%s1284_s3 + $0x30] sm:$0xff]   ;;  %vm1115_vm0 = vmmov 0   ;;  %v1075_v30 = vld [vmem:[%s1284_s3 + $0x28] sm:$0xff]  }
 0x100   : > { %988 = vmatprep.subr.bf16.mxu0 %v1114_v28  ;;  %1008 = vmatprep.subr.bf16.mxu1 %v1114_v28  ;;  %v925_v32 = vld [vmem:[%s1283_s2] ss:$0 sm:$0xff]  ;;  %v1081_v34 = vld [vmem:[%s1286_s5 + $0x38] sm:$0xff]   ;;  %v1082_v37 = vld [vmem:[%s1286_s5 + $0x30] sm:$0xff]  }
 0x101   : > { %989 = vmatpush3.bf16.msra.mxu0 %v1073_v27  ;;  %1004 = vmatprep.mubr.msk.bf16.mxu0 %vm1115_vm0, %v1114_v28  ;;  %v1076_v35 = vld [vmem:[%s1284_s3 + $0x20] sm:$0xff]   ;;  %v1077_v39 = vld [vmem:[%s1284_s3 + $0x18] sm:$0xff]   ;;  %v1083_v40 = vld [vmem:[%s1286_s5 + $0x28] sm:$0xff]  }
 0x102   : > { %990 = vmatprep.subr.bf16.mxu0 %v1114_v28  ;;  %1024 = vmatprep.mubr.msk.bf16.mxu1 %vm1115_vm0, %v1114_v28  ;;  %v1078_v41 = vld [vmem:[%s1284_s3 + $0x10] sm:$0xff]   ;;  %v1084_v42 = vld [vmem:[%s1286_s5 + $0x20] sm:$0xff]   ;;  %v1079_v43 = vld [vmem:[%s1284_s3 + $0x8] sm:$0xff]  }
 0x103   : > { %1009 = vmatpush3.bf16.msra.mxu1 %v1081_v34  ;;  %v1085_v44 = vld [vmem:[%s1286_s5 + $0x18] sm:$0xff]   ;;  %v1080_v45 = vld [vmem:[%s1284_s3] sm:$0xff]   ;;  %v1086_v46 = vld [vmem:[%s1286_s5 + $0x10] sm:$0xff]  }
 0x104   : > { %1010 = vmatprep.subr.bf16.mxu1 %v1114_v28  ;;  %v1087_v47 = vld [vmem:[%s1286_s5 + $0x8] sm:$0xff]   ;;  %v1088_v48 = vld [vmem:[%s1286_s5] sm:$0xff]  }
 0x105   : > { %991 = vmatpush3.bf16.msra.mxu0 %v1074_v29  ;;  %v554_v31 = vld [vmem:[#allocation2] sm:$0xff] }
 0x106   : > { %992 = vmatprep.subr.bf16.mxu0 %v1114_v28  ;;  %v562_v33 = vadd.f32 %v925_v32, %v554_v31  ;;  %v926_v49 = vld [vmem:[%s1285_s4] ss:$0 sm:$0xff] }
 0x107   : > { %1011 = vmatpush3.bf16.msra.mxu1 %v1082_v37  ;;  %v935_v57 = vld [vmem:[%s1287_s6] ss:$0 sm:$0xff] }
 0x108   : > { %v563_v36 = vmax.f32 %v562_v33, 0.0  ;;  %1012 = vmatprep.subr.bf16.mxu1 %v1114_v28 }
 0x109   : > { %993 = vmatpush3.bf16.msra.mxu0 %v1075_v30 }
 0x10a   : > { %994 = vmatprep.subr.bf16.mxu0 %v1114_v28  ;;  %v564_v38 = vpack.c.bf16 %v563_v36, %v563_v36 }
 0x10b   : > { %1013 = vmatpush3.bf16.msra.mxu1 %v1083_v40 }
 0x10c   : > { %565 = vst [vmem:[%s1288_s7] sm:$0xf] %v564_v38  ;;  %1014 = vmatprep.subr.bf16.mxu1 %v1114_v28 }
 0x10d   : > { %995 = vmatpush3.bf16.msra.mxu0 %v1076_v35 }
 0x10e   : > { %996 = vmatprep.subr.bf16.mxu0 %v1114_v28 }
 0x10f   : > { %1015 = vmatpush3.bf16.msra.mxu1 %v1084_v42 }
 0x110   : > { %1016 = vmatprep.subr.bf16.mxu1 %v1114_v28 }
 0x111   : > { %997 = vmatpush3.bf16.msra.mxu0 %v1077_v39 }
 0x112   : > { %998 = vmatprep.subr.bf16.mxu0 %v1114_v28 }
 0x113   : > { %1017 = vmatpush3.bf16.msra.mxu1 %v1085_v44 }
 0x114   : > { %1018 = vmatprep.subr.bf16.mxu1 %v1114_v28 }
 0x115   : > { %999 = vmatpush3.bf16.msra.mxu0 %v1078_v41 }
 0x116   : > { %1000 = vmatprep.subr.bf16.mxu0 %v1114_v28 }
 0x117   : > { %1019 = vmatpush3.bf16.msra.mxu1 %v1086_v46 }
 0x118   : > { %1020 = vmatprep.subr.bf16.mxu1 %v1114_v28 }
 0x119   : > { %1001 = vmatpush3.bf16.msra.mxu0 %v1079_v43 }
 0x11a   : > { %1002 = vmatprep.subr.bf16.mxu0 %v1114_v28 }
 0x11b   : > { %1021 = vmatpush3.bf16.msra.mxu1 %v1087_v47 }
 0x11c   : > { %1022 = vmatprep.subr.bf16.mxu1 %v1114_v28 }
 0x11d   : > { %1003 = vmatpush3.bf16.msra.mxu0 %v1080_v45 }
 0x11f   : > { %1023 = vmatpush3.bf16.msra.mxu1 %v1088_v48 }
 0x120   : > { %1005 = vmatmul.mubr.bf16.vlgmr.msra.gmra.mxu0 %v564_v38 }
 0x1e0   : > { %v671_v50 = vpop.f32.mrf.mxu0 }
 0x1e1   : > { %v672_v51 = vadd.f32 %v926_v49, %v671_v50 }
 0x1e2   : > { %v1006_v52 = vpop.f32.mrf.mxu0 }
 0x1e3   : > { %v677_v53 = vmax.f32 %v672_v51, 0.0 }
 0x1e4   : > { %v674_v54 = vpop.f32.mrf.mxu0 }
 0x1e5   : > { %v678_v55 = vpack.c.bf16 %v677_v53, %v677_v53 }
 0x1e6   : > { %v1007_v56 = vpop.f32.mrf.mxu0 }
 0x1e7   : > { %1025 = vmatmul.mubr.bf16.vlgmr.msra.gmra.mxu1 %v678_v55 }
 0x2a7   : > { %v784_v58 = vpop.f32.mrf.mxu1 }
 0x2a8   : > { %v785_v59 = vadd.f32 %v935_v57, %v784_v58 }
 0x2a9   : > { %v1026_v60 = vpop.f32.mrf.mxu1 }
 0x2aa   : > { %v790_v61 = vpack.c.bf16 %v785_v59, %v785_v59 }
 0x2ab   : > { %v787_v62 = vpop.f32.mrf.mxu1 }
 0x2ac   : > { %791 = vst [vmem:[%s1289_s8] sm:$0xf] %v790_v61 }
 0x2ad   : > { %v1027_v63 = vpop.f32.mrf.mxu1 }
 0x2ae PF: > { %s19_s29 = sadd.s32 1, %s1111_s29   ;;  %s1290_s27 = smov %s1107_s28 }
 0x2af   : > { %p16_p8 = scmp.ge.s32.totalorder %s19_s29, 6   ;;  %s1291_s28 = smov %s1293_s30 }
 0x2b1   :  { %18 = sbr.rel (!%p16_p8) target bundleno = 2 (0x2), region = 101 }

</bundles_post_ra>
